<compile_context>
chip_gen: v7x
topology: tpu7x:2x2x1
jax: 0.10.0
libtpu: 0.0.40
codegen_flags: <defaults>
</compile_context>

<pallas_src>
import functools
import math

import jax
import jax.numpy as jnp
from jax import lax
from jax.experimental import pallas as pl
from jax.experimental.pallas import tpu as pltpu

_TWO_PI = 2.0 * math.pi


def _uniform_open01(bits_u32):
    """uint32 bits -> f32 uniform in (0, 1] via the mantissa trick (top 23 bits)."""
    f = lax.bitcast_convert_type((bits_u32 >> 9) | jnp.uint32(0x3F800000), jnp.float32)
    return jnp.float32(2.0) - f  # f in [1, 2)  ->  (0, 1], keeps log() finite


def _uniform_halfopen01(bits_u32):
    """uint32 bits -> f32 uniform in [0, 1)."""
    f = lax.bitcast_convert_type((bits_u32 >> 9) | jnp.uint32(0x3F800000), jnp.float32)
    return f - jnp.float32(1.0)


def _gaussian_noise_kernel(x_ref, bits_ref, out_ref, *, mean, std):
    """out = x + (mean + std * z), z ~ N(0,1) via Box-Muller on raw uint32 bits."""
    bits = bits_ref[...]
    tb = bits.shape[0]

    if tb % 2 == 0:
        # Use BOTH Box-Muller outputs: each (u1, u2) pair yields two independent
        # normals, so one log/sqrt and one cos+sin cover TWO output rows.
        half = tb // 2
        u1 = _uniform_open01(bits[:half])       # (0, 1]
        u2 = _uniform_halfopen01(bits[half:])   # [0, 1)
        r = jnp.sqrt(jnp.float32(-2.0) * jnp.log(u1))
        t = jnp.float32(_TWO_PI) * u2
        z = jnp.concatenate([r * jnp.cos(t), r * jnp.sin(t)], axis=0)
    else:
        # Odd row-count fallback (tiny odd batch): two 16-bit uniforms per word.
        inv = jnp.float32(1.0 / 65536.0)
        lo = (bits & jnp.uint32(0xFFFF)).astype(jnp.float32) * inv
        hi = (bits >> 16).astype(jnp.float32) * inv
        u1 = jnp.float32(1.0) - lo  # (0, 1]
        r = jnp.sqrt(jnp.float32(-2.0) * jnp.log(u1))
        z = r * jnp.cos(jnp.float32(_TWO_PI) * hi)

    noise = jnp.float32(mean) + jnp.float32(std) * z
    out_ref[...] = x_ref[...] + noise.astype(x_ref.dtype)


def _choose_tile_b(B, D):
    """Rows per grid step: big enough to pipeline well (~85% of HBM roofline needs
    >=512-row-ish tiles), small enough that x + bits + out, each double-buffered,
    stay well under the default scoped VMEM limit on every generation (v7x included)."""
    if B <= 8:
        return B  # full batch dim -> always a legal block shape
    max_rows_by_vmem = max(8, (4 * 1024 * 1024) // (4 * D))  # ~<=4 MiB f32 per tile
    tile = min(B, 1024, max_rows_by_vmem)
    return max(8, (tile // 8) * 8)  # multiple of 8 sublanes (and even)


def gaussian_noise(x, *, std, mean=0.0, key=None, training=True):
    """Pallas equivalent of GaussianNoise.forward.

    training=True : returns x + noise, noise ~ N(mean, std) sampled fresh from `key`
                    (matches self.noise.data.normal_(mean, std); return x + self.noise).
                    Pass a different `key` each call to mimic torch's advancing RNG state.
    training=False: returns x unchanged.
    """
    if not training:
        return x
    if key is None:
        key = jax.random.PRNGKey(0)

    B, D = x.shape
    # Raw random words; the normal transform happens inside the kernel.
    bits = jax.random.bits(key, (B, D), dtype=jnp.uint32)

    tile_b = _choose_tile_b(B, D)
    grid = (pl.cdiv(B, tile_b),)
    kernel = functools.partial(_gaussian_noise_kernel, mean=float(mean), std=float(std))

    # NOTE: block last dim is the full D (always legal). If D is small / not a
    # multiple of 128, stores are masked but still correct; a production path could
    # flatten to a lane-dense slab in the wrapper.
    return pl.pallas_call(
        kernel,
        out_shape=jax.ShapeDtypeStruct((B, D), x.dtype),
        grid=grid,
        in_specs=[
            pl.BlockSpec((tile_b, D), lambda i: (i, 0)),  # x
            pl.BlockSpec((tile_b, D), lambda i: (i, 0)),  # random bits
        ],
        out_specs=pl.BlockSpec((tile_b, D), lambda i: (i, 0)),
        compiler_params=pltpu.CompilerParams(
            dimension_semantics=("parallel",),  # megacore sharding on v7x; no-op elsewhere
        ),
    )(x, bits)


if __name__ == "__main__":
    key = jax.random.PRNGKey(0)
    kx, kn = jax.random.split(key)

    batch_size, input_dim = 8, 128
    std, mean = 0.5, 0.0

    x = jax.random.normal(kx, (batch_size, input_dim), dtype=jnp.float32)

    # training path: x + fresh Gaussian noise
    y_train = gaussian_noise(x, std=std, mean=mean, key=kn, training=True)
    y_train = jax.block_until_ready(y_train)

    # eval path: identity
    y_eval = gaussian_noise(x, std=std, mean=mean, key=kn, training=False)
    y_eval = jax.block_until_ready(y_eval)

    # sanity checks
    assert y_train.shape == x.shape and y_train.dtype == x.dtype
    assert jnp.allclose(y_eval, x)
    noise = y_train - x
    assert bool(jnp.all(jnp.isfinite(noise)))
    # noise should be roughly N(0, 0.5): loose statistical sanity bounds
    assert abs(float(noise.mean())) < 0.25
    assert 0.25 < float(noise.std()) < 0.9

    print("KERNEL_OK")
</pallas_src>

<mosaic_0001>
module attributes {stable_mosaic.version = 11 : i64} {
  func.func @_gaussian_noise_kernel(%arg0: i32, %arg1: memref<8x128xf32, #tpu.memory_space<vmem>>, %arg2: memref<8x128xi32, #tpu.memory_space<vmem>>, %arg3: memref<8x128xf32, #tpu.memory_space<vmem>>) attributes {dimension_semantics = [#tpu.dimension_semantics<parallel>], iteration_bounds = array<i64: 1>, scalar_prefetch = 0 : i64, scratch_operands = 0 : i64, tpu.core_type = #tpu.core_type<tc>, window_params = [{transform_indices = @transform_0, window_bounds = array<i64: 8, 128>}, {transform_indices = @transform_1, window_bounds = array<i64: 8, 128>}, {transform_indices = @transform_2, window_bounds = array<i64: 8, 128>}]} {
    %c0 = arith.constant 0 : index
    %c0_0 = arith.constant 0 : index
    %0 = vector.load %arg2[%c0, %c0_0] : memref<8x128xi32, #tpu.memory_space<vmem>>, vector<8x128xi32>
    %1 = vector.extract_strided_slice %0 {offsets = [0, 0], sizes = [4, 128], strides = [1, 1]} : vector<8x128xi32> to vector<4x128xi32>
    %c9_i32 = arith.constant 9 : i32
    %2 = vector.broadcast %c9_i32 : i32 to vector<4x128xi32>
    %3 = arith.shrui %1, %2 : vector<4x128xi32>
    %c1065353216_i32 = arith.constant 1065353216 : i32
    %4 = vector.broadcast %c1065353216_i32 : i32 to vector<4x128xi32>
    %5 = arith.ori %3, %4 : vector<4x128xi32>
    %6 = tpu.bitcast %5 : vector<4x128xi32> -> vector<4x128xf32>
    %cst = arith.constant 2.000000e+00 : f32
    %7 = vector.broadcast %cst : f32 to vector<4x128xf32>
    %8 = arith.subf %7, %6 : vector<4x128xf32>
    %9 = vector.extract_strided_slice %0 {offsets = [4, 0], sizes = [4, 128], strides = [1, 1]} : vector<8x128xi32> to vector<4x128xi32>
    %c9_i32_1 = arith.constant 9 : i32
    %10 = vector.broadcast %c9_i32_1 : i32 to vector<4x128xi32>
    %11 = arith.shrui %9, %10 : vector<4x128xi32>
    %c1065353216_i32_2 = arith.constant 1065353216 : i32
    %12 = vector.broadcast %c1065353216_i32_2 : i32 to vector<4x128xi32>
    %13 = arith.ori %11, %12 : vector<4x128xi32>
    %14 = tpu.bitcast %13 : vector<4x128xi32> -> vector<4x128xf32>
    %cst_3 = arith.constant 1.000000e+00 : f32
    %15 = vector.broadcast %cst_3 : f32 to vector<4x128xf32>
    %16 = arith.subf %14, %15 : vector<4x128xf32>
    %17 = math.log %8 : vector<4x128xf32>
    %cst_4 = arith.constant -2.000000e+00 : f32
    %18 = vector.broadcast %cst_4 : f32 to vector<4x128xf32>
    %19 = arith.mulf %18, %17 : vector<4x128xf32>
    %20 = math.sqrt %19 : vector<4x128xf32>
    %cst_5 = arith.constant 6.28318548 : f32
    %21 = vector.broadcast %cst_5 : f32 to vector<4x128xf32>
    %22 = arith.mulf %21, %16 : vector<4x128xf32>
    %23 = math.cos %22 : vector<4x128xf32>
    %24 = arith.mulf %20, %23 : vector<4x128xf32>
    %25 = math.sin %22 : vector<4x128xf32>
    %26 = arith.mulf %20, %25 : vector<4x128xf32>
    %27 = tpu.concatenate %24, %26 in 0 : vector<4x128xf32>, vector<4x128xf32> -> vector<8x128xf32>
    %cst_6 = arith.constant 5.000000e-01 : f32
    %28 = vector.broadcast %cst_6 : f32 to vector<8x128xf32>
    %29 = arith.mulf %28, %27 : vector<8x128xf32>
    %cst_7 = arith.constant 0.000000e+00 : f32
    %30 = vector.broadcast %cst_7 : f32 to vector<8x128xf32>
    %31 = arith.addf %30, %29 : vector<8x128xf32>
    %c0_8 = arith.constant 0 : index
    %c0_9 = arith.constant 0 : index
    %32 = vector.load %arg1[%c0_8, %c0_9] : memref<8x128xf32, #tpu.memory_space<vmem>>, vector<8x128xf32>
    %33 = arith.addf %32, %31 : vector<8x128xf32>
    %c0_10 = arith.constant 0 : index
    %c0_11 = arith.constant 0 : index
    %34 = vector.load %arg3[%c0_10, %c0_11] : memref<8x128xf32, #tpu.memory_space<vmem>>, vector<8x128xf32>
    tpu.vector_store %arg3[%c0_10, %c0_11], %33 {strides = array<i32>} : memref<8x128xf32, #tpu.memory_space<vmem>>, vector<8x128xf32>,
    return
  }
  func.func @transform_0(%arg0: i32) -> (i32, i32) {
    %c0_i32 = arith.constant 0 : i32
    %c0_i32_0 = arith.constant 0 : i32
    return %arg0, %c0_i32 : i32, i32
  }
  func.func @transform_1(%arg0: i32) -> (i32, i32) {
    %c0_i32 = arith.constant 0 : i32
    %c0_i32_0 = arith.constant 0 : i32
    return %arg0, %c0_i32 : i32, i32
  }
  func.func @transform_2(%arg0: i32) -> (i32, i32) {
    %c0_i32 = arith.constant 0 : i32
    %c0_i32_0 = arith.constant 0 : i32
    return %arg0, %c0_i32 : i32, i32
  }
}

</mosaic_0001>

<bundles_post_ra>
// kernel: tpu_custom_call.1
= control target key start
LH: loop header
LB: loop body
LE: loop exit
PB: predicated region body
PF: predicated region fallthrough
CT: control target
= control target key end

     0   :  { %7 = vsyncpa [#allocation3], 0  ;;  %s485_s0 = inlined_call_operand.hbm [shape: f32[8,128], index: 0, kind: input, shape index: {}]   ;;  %s486_s1 = inlined_call_operand.hbm [shape: u32[8,128], index: 1, kind: input, shape index: {}]   ;;  %s487_s2 = inlined_call_operand.hbm [shape: f32[8,128], index: 2, kind: output, shape index: {}]  }
   0x1   :  { %8 = vsyncpa [#allocation6], 0 }
   0x2   :  { %9 = vsyncpa [#allocation4], 0  ;;  %s396_s9 = smov [#allocation2]   ;;  %s397_s11 = smov [#allocation5]  }
   0x3   :  { %s16_s10 = sshll.u32 %s396_s9, 4  ;;  %s26_s12 = sshll.u32 %s397_s11, 4  ;;  %s17_s10 = int_to_ptr.vmem [resolvable:$true] %s16_s10  ;;  %s27_s12 = int_to_ptr.vmem [resolvable:$true] %s26_s12 }
   0x4   :  { %s324_s15 = scalar_lea.hbm %s485_s0, 128 }
   0x5   :  { %p325_p0 = scmp.ne.s32.totalorder %s485_s0, %s324_s15  ;;  %p328_p1 = scmp.lt.u32.totalorder %s324_s15, %s485_s0 }
   0x7   :  { %p330_p2 = pnand %p328_p1, %p325_p0 }
   0x9   :  { %333 = shalt.err (!%p330_p2)
}
   0xa   :  { %s334_s20 = scalar_lea.vmem %s17_s10, 128  ;;  %p339_p4 = scmp.lt.s32.totalorder %s17_s10, %s17_s10 }
   0xb   :  { %p335_p3 = scmp.ne.s32.totalorder %s17_s10, %s334_s20  ;;  %p340_p5 = scmp.lt.s32.totalorder %s334_s20, %s334_s20 }
   0xd   :  { %p341_p6 = por %p340_p5, %p339_p4 }
   0xf   :  { %p342_p7 = pnand %p341_p6, %p335_p3 }
  0x11   :  { %345 = shalt.err (!%p342_p7)
}
  0x12   :  { %19 = dma.hbm_to_vmem [thread:$0]  %s485_s0, 128, %s17_s10, [#allocation3]  }
  0x13   :  { %s346_s25 = scalar_lea.hbm %s486_s1, 128 }
  0x14   :  { %p347_p8 = scmp.ne.s32.totalorder %s486_s1, %s346_s25  ;;  %p350_p9 = scmp.lt.u32.totalorder %s346_s25, %s486_s1 }
  0x16   :  { %p352_p10 = pnand %p350_p9, %p347_p8 }
  0x18   :  { %355 = shalt.err (!%p352_p10)
}
  0x19   :  { %s356_s30 = scalar_lea.vmem %s27_s12, 128  ;;  %p361_p12 = scmp.lt.s32.totalorder %s27_s12, %s27_s12 }
  0x1a   :  { %p357_p11 = scmp.ne.s32.totalorder %s27_s12, %s356_s30  ;;  %p362_p13 = scmp.lt.s32.totalorder %s356_s30, %s356_s30 }
  0x1c   :  { %p363_p0 = por %p362_p13, %p361_p12 }
  0x1e   :  { %p364_p1 = pnand %p363_p0, %p357_p11 }
  0x20   :  { %367 = shalt.err (!%p364_p1)
}
  0x21   :  { %29 = dma.hbm_to_vmem [thread:$0]  %s486_s1, 128, %s27_s12, [#allocation6]  }
  0x22   :  { %390 = dma.done.wait [#allocation3], 128  }
  0x23   :  { %391 = vsyncadd [#allocation3], 4294967168 }
  0x24   :  { %392 = dma.done.wait [#allocation6], 128  }
  0x25   :  { %393 = vsyncadd [#allocation6], 4294967168  ;;  %v36_v0 = vld [vmem:[#allocation5] sm:$0xff]  ;;  %v398_v16 = vmov 683565275   ;;  %s404_s1 = smov [#allocation7]  }
  0x26   :  { %v37_v1 = vshrl.u32 %v36_v0, 9  ;;  %v399_v18 = vmov 2475754826   ;;  %v400_v20 = vmov 2131351028   ;;  %s284_s4 = sshll.u32 %s404_s1, 4  ;;  %s285_s4 = int_to_ptr.vmem [resolvable:$true] %s284_s4 }
  0x27   :  { %v401_v26 = vmov 2102212464   ;;  %v402_v29 = vmov 920167782   ;;  %v403_v32 = vmov 1326507024   ;;  %p373_p3 = scmp.lt.s32.totalorder %s285_s4, %s285_s4 }
  0x28   :  { %v444_v2 = vor.u32 1065353216, %v37_v1  ;;  %s368_s5 = scalar_lea.vmem %s285_s4, 128 }
  0x29   :  { %p369_p2 = scmp.ne.s32.totalorder %s285_s4, %s368_s5  ;;  %p374_p4 = scmp.lt.s32.totalorder %s368_s5, %s368_s5 }
  0x2a   :  { %v294_v3 = vadd.f32 -1.0, %v444_v2  ;;  %v40_v62 = vsub.f32 2.0, %v444_v2 }
  0x2b   :  { %p375_p5 = por %p374_p4, %p373_p3 }
  0x2c   :  { %v447_v4 = vmul.f32 6.2831855, %v294_v3  ;;  %316 = vlog2.f32 %v40_v62 }
  0x2d   :  { %p376_p6 = pnand %p375_p5, %p369_p2 }
  0x2e   :  { %v56_v5 = vand.u32 2139095040, %v447_v4  ;;  %v53_v6 = vand.u32 2147483647, %v447_v4  ;;  %vm55_vm7 = vcmp.lt.s32.totalorder %v447_v4, 0  ;;  %vm145_vm12 = vweird.f32 %v447_v4 }
  0x30   :  { %v57_v7 = vshrl.u32 %v56_v5, 23  ;;  %v60_v9 = vand.u32 8388607, %v53_v6  ;;  %vm54_vm8 = vcmp.le.f32.partialorder %v53_v6, 0.7853982 }
  0x32   :  { %v295_v8 = vadd.s32 4294967169, %v57_v7  ;;  %v61_v11 = vor.u32 8388608, %v60_v9 }
  0x34   :  { %v63_v10 = vadd.s32 1, %v295_v8  ;;  %v101_v22 = vshll.u32 %v61_v11, 8 }
  0x36   :  { %vm64_vm0 = vcmp.gt.s32.totalorder %v63_v10, 0 }
  0x37   :  { %v65_v12 = vsel %vm64_vm0, %v63_v10, 0 }
  0x38   :  { %v67_v13 = vand.u32 31, %v65_v12  ;;  %v66_v14 = vshrl.u32 %v65_v12, 5  ;;  %v317_v12 = vpop.eup %316 }
  0x3a   :  { %v68_v15 = vsub.s32 32, %v67_v13  ;;  %v70_v17 = vshll.u32 %v398_v16, %v67_v13  ;;  %v73_v19 = vshll.u32 %v399_v18, %v67_v13  ;;  %v76_v21 = vshll.u32 %v400_v20, %v67_v13 }
  0x3b   :  { %v79_v28 = vshll.u32 %v401_v26, %v67_v13  ;;  %v82_v31 = vshll.u32 %v402_v29, %v67_v13  ;;  %vm85_vm1 = vcmp.lt.s32.totalorder %v66_v14, 1  ;;  %vm86_vm2 = vcmp.lt.s32.totalorder %v66_v14, 2 }
  0x3c   :  { %v69_v23 = vshrl.u32 %v398_v16, %v68_v15  ;;  %v71_v24 = vshrl.u32 %v399_v18, %v68_v15  ;;  %v74_v25 = vshrl.u32 %v400_v20, %v68_v15  ;;  %v77_v27 = vshrl.u32 %v401_v26, %v68_v15 }
  0x3d   :  { %v80_v30 = vshrl.u32 %v402_v29, %v68_v15  ;;  %v83_v33 = vshrl.u32 %v403_v32, %v68_v15  ;;  %vm87_vm3 = vcmp.lt.s32.totalorder %v66_v14, 3  ;;  %vm88_vm4 = vcmp.lt.s32.totalorder %v66_v14, 4 }
  0x3e   :  { %v72_v34 = vor.u32 %v71_v24, %v70_v17  ;;  %v75_v35 = vor.u32 %v74_v25, %v73_v19  ;;  %v78_v36 = vor.u32 %v77_v27, %v76_v21  ;;  %v43_v15 = vmul.f32 0.6931472, %v317_v12 }
  0x3f   :  { %v81_v37 = vor.u32 %v80_v30, %v79_v28  ;;  %v84_v38 = vor.u32 %v83_v33, %v82_v31 }
  0x40   :  { %v89_v39 = vsel %vm85_vm1, %v69_v23, %v72_v34  ;;  %v93_v40 = vsel %vm85_vm1, %v72_v34, %v75_v35  ;;  %v97_v41 = vsel %vm85_vm1, %v75_v35, %v78_v36  ;;  %v90_v42 = vsel %vm88_vm4, %v78_v36, 2102212464 }
  0x41   :  { %v94_v43 = vsel %vm88_vm4, %v81_v37, 920167782  ;;  %v98_v44 = vsel %vm88_vm4, %v84_v38, 1326507024  ;;  %v91_v45 = vsel %vm87_vm3, %v75_v35, %v90_v42  ;;  %v44_v19 = vmul.f32 -2.0, %v43_v15 }
  0x42   :  { %v95_v46 = vsel %vm87_vm3, %v78_v36, %v94_v43  ;;  %v99_v47 = vsel %vm87_vm3, %v81_v37, %v98_v44  ;;  %v92_v48 = vsel %vm86_vm2, %v89_v39, %v91_v45 }
  0x43   :  { %v96_v49 = vsel %vm86_vm2, %v93_v40, %v95_v46  ;;  %v100_v50 = vsel %vm86_vm2, %v97_v41, %v99_v47  ;;  %v108_v55 = vmul.u32 %v101_v22, %v92_v48  ;;  %318 = vrsqrt.f32 %v44_v19 }
  0x44   :  { %v453_v51 = vmul.u32.u64.low %v101_v22, %v100_v50  ;;  %v454_v52 = vmul.u32.u64.high %v101_v22, %v100_v50, %v453_v51  ;;  %v456_v53 = vmul.u32.u64.low %v101_v22, %v96_v49  ;;  %v457_v54 = vmul.u32.u64.high %v101_v22, %v96_v49, %v456_v53 }
  0x45   :  { %vm47_vm9 = vcmp.eq.f32.partialorder %v44_v19, inf  ;;  %v50_v35 = vand.u32 2147483648, %v44_v19  ;;  %vm49_vm1 = vcmp.eq.f32.partialorder %v44_v19, 0.0  ;;  %vm271_vm2 = vcmask 1043456  }
  0x46   :  { %vm110_vm5 = vc.u32 %v454_v52, %v456_v53  ;;  %v111_v56 = vadd.s32 1, %v457_v54  ;;  %v109_v7 = vadd.s32 %v456_v53, %v454_v52  ;;  %v275_v53 = vld [vmem:[#allocation2] sm:$0xff] }
  0x48   :  { %v112_v57 = vsel %vm110_vm5, %v111_v56, %v457_v54 }
  0x49   :  { %v113_v58 = vadd.s32 %v112_v57, %v108_v55 }
  0x4b   :  { %v114_v59 = vadd.s32 536870912, %v113_v58 }
  0x4d   :  { %v115_v60 = vshrl.u32 %v114_v59, 30  ;;  %v319_v29 = vpop.eup %318 }
  0x4e   :  { %v46_v32 = vmul.f32 %v319_v29, %v44_v19 }
  0x4f   :  { %v116_v61 = vshll.u32 %v115_v60, 30  ;;  %v139_v21 = vsub.s32 4, %v115_v60 }
  0x50   :  { %v48_v37 = vsel %vm47_vm9, %v44_v19, %v46_v32 }
  0x51   :  { %v117_v63 = vsub.s32 %v113_v58, %v116_v61  ;;  %v140_v24 = vsel %vm55_vm7, %v139_v21, %v115_v60  ;;  %v51_v44 = vsel %vm49_vm1, %v50_v35, %v48_v37 }
  0x52   :  { %v142_v27 = vsel %vm54_vm8, 0, %v140_v24 }
  0x53   :  { %v119_v0 = vsub.s32 0, %v117_v63  ;;  %v253_v28 = vadd.s32 3, %v142_v27  ;;  %v146_v30 = vand.u32 3, %v142_v27 }
  0x55   :  { %v296_v1 = vmin.u32 %v119_v0, %v117_v63  ;;  %v254_v31 = vand.u32 3, %v253_v28  ;;  %vm151_vm10 = vcmp.eq.s32.totalorder %v146_v30, 2  ;;  %vm148_vm13 = vcmp.eq.s32.totalorder %v146_v30, 0 }
  0x56   :  { %vm147_vm15 = vcmp.lt.s32.totalorder %v146_v30, 2 }
  0x57   :  { %v121_v3 = vclz %v296_v1  ;;  %vm259_vm11 = vcmp.eq.s32.totalorder %v254_v31, 2  ;;  %vm256_vm14 = vcmp.eq.s32.totalorder %v254_v31, 0  ;;  %vm255_vm0 = vcmp.lt.s32.totalorder %v254_v31, 2 }
  0x59   :  { %v297_v5 = vadd.s32 4294967294, %v121_v3 }
  0x5b   :  { %vm298_vm6 = vcmp.lt.s32.totalorder %v297_v5, 0 }
  0x5c   :  { %v124_v8 = vsel %vm298_vm6, 0, %v297_v5 }
  0x5d   :  { %v125_v9 = vsub.s32 32, %v124_v8  ;;  %v126_v10 = vshll.u32 %v117_v63, %v124_v8  ;;  %v129_v11 = vsub.s32 4294967266, %v124_v8 }
  0x5f   :  { %v127_v13 = vshrl.u32 %v109_v7, %v125_v9  ;;  %v130_v14 = vadd.s32 127, %v129_v11 }
  0x61   :  { %v128_v16 = vor.u32 %v127_v13, %v126_v10  ;;  %v131_v17 = vshll.u32 %v130_v14, 23 }
  0x63   :  { %v132_v2 = vor.u32 4788187, %v131_v17  ;;  %v135_v18 = vcvt.s32.f32 %v128_v16 }
  0x65   :  { %v133_v20 = vand.u32 2147483647, %v132_v2 }
  0x67   :  { %v136_v22 = vmul.f32 %v135_v18, %v133_v20 }
  0x69   :  { %v137_v23 = vxor.u32 2147483648, %v136_v22 }
  0x6b   :  { %v138_v25 = vsel %vm55_vm7, %v137_v23, %v136_v22 }
  0x6c   :  { %v141_v26 = vsel %vm54_vm8, %v447_v4, %v138_v25 }
  0x6d   :  { %320 = vcosq.f32 %v141_v26 }
  0x6e   :  { %322 = vsinq.f32 %v141_v26 }
  0x77   :  { %v321_v33 = vpop.eup %320 }
  0x78   :  { %v323_v34 = vpop.eup %322  ;;  %v152_v6 = vxor.u32 2147483648, %v321_v33 }
  0x79   :  { %v149_v36 = vxor.u32 2147483648, %v323_v34 }
  0x7a   :  { %v153_v38 = vsel %vm151_vm10, %v152_v6, %v323_v34  ;;  %v261_v39 = vsel %vm259_vm11, %v152_v6, %v323_v34 }
  0x7b   :  { %v150_v40 = vsel %vm148_vm13, %v321_v33, %v149_v36  ;;  %v258_v41 = vsel %vm256_vm14, %v321_v33, %v149_v36 }
  0x7c   :  { %v154_v42 = vsel %vm147_vm15, %v150_v40, %v153_v38  ;;  %v262_v43 = vsel %vm255_vm0, %v258_v41, %v261_v39 }
  0x7d   :  { %v155_v45 = vsel %vm145_vm12, nan, %v154_v42  ;;  %v263_v46 = vsel %vm145_vm12, nan, %v262_v43 }
  0x7e   :  { %v157_v47 = vrot.slane %v155_v45, 4  ;;  %v265_v48 = vrot.slane %v263_v46, 4 }
  0x80   :  { %v159_v49 = vmul.f32 %v157_v47, %v51_v44  ;;  %v267_v50 = vmul.f32 %v265_v48, %v51_v44 }
  0x82   :  { %v269_v51 = vrot.slane %v267_v50, 4 }
  0x84   :  { %v272_v52 = vsel %vm271_vm2, %v159_v49, %v269_v51 }
  0x85   :  { %v273_v54 = vmul.f32 0.5, %v272_v52 }
  0x87   :  { %v276_v55 = vadd.f32 %v275_v53, %v273_v54 }
  0x89   :  { %277 = vst [vmem:[#allocation7] sm:$0xff] %v276_v55 }
  0x8a   :  { %379 = shalt.err (!%p376_p6)
}
  0x8b   :  { %s380_s8 = scalar_lea.hbm %s487_s2, 128 }
  0x8c   :  { %p381_p7 = scmp.ne.s32.totalorder %s487_s2, %s380_s8  ;;  %p384_p8 = scmp.lt.u32.totalorder %s380_s8, %s487_s2 }
  0x8e   :  { %p386_p9 = pnand %p384_p8, %p381_p7 }
  0x90   :  { %389 = shalt.err (!%p386_p9)
}
  0x91   :  { %287 = dma.vmem_to_hbm [thread:$0]  %s285_s4, 128, %s487_s2, [#allocation4]  }
  0x92   :  { %394 = dma.done.wait [#allocation4], 128  }
  0x93   :  { %395 = vsyncadd [#allocation4], 4294967168 }
  0x94   :  { %291 = vsyncpa [#allocation3], 1 }
  0x95   :  { %292 = vsyncpa [#allocation6], 1 }
  0x96   :  { %293 = vsyncpa [#allocation4], 1 }

</bundles_post_ra>
